<compile_context>
chip_gen: v5e
topology: v5e:2x2
jax: 0.10.0
libtpu: 0.0.40
codegen_flags: <defaults>
</compile_context>

<pallas_src>
import functools

import jax
import jax.numpy as jnp
from jax.experimental import pallas as pl
from jax.experimental.pallas import tpu as pltpu

_EPS = 1e-6  # matches torch.nn.functional.pairwise_distance default eps


def _round_up(x, m):
    return ((x + m - 1) // m) * m


def _choose_tile_n(n, d):
    # Keep 3 inputs x 2 pipeline buffers x TILE_N x D x 4B within ~12 MiB so
    # the kernel fits the default/raised scoped VMEM on every TPU generation
    # (v5e 16 MiB default, v6e/v7x 32 MiB; v7x has only 64 MiB physical).
    budget = 12 * 1024 * 1024
    per_row = 3 * 2 * d * 4
    max_rows = max(8, budget // per_row)
    tile = min(512, max_rows, _round_up(n, 8))
    return max(8, (tile // 8) * 8)


def _triplet_kernel(fv_ref, fpos_ref, fneg_ref, sq_ref, *, n_rows, tile_n):
    i = pl.program_id(0)

    fv = fv_ref[...].astype(jnp.float32)
    fpos = fpos_ref[...].astype(jnp.float32)
    fneg = fneg_ref[...].astype(jnp.float32)

    # pairwise_distance: ||x1 - x2 + eps||_2 along the feature (last) axis
    diff_pos = fv - fpos + _EPS
    diff_neg = fv - fneg + _EPS
    d_pos = jnp.sqrt(jnp.sum(diff_pos * diff_pos, axis=-1, keepdims=True))  # (tile_n, 1)
    d_neg = jnp.sqrt(jnp.sum(diff_neg * diff_neg, axis=-1, keepdims=True))  # (tile_n, 1)

    # softmax over the 2-vector [d_pos, d_neg] collapses to a sigmoid:
    #   s_pos = sigmoid(d_pos - d_neg),  s_neg = 1 - s_pos
    # squared error vs the [0, 1] target is s_pos^2 + (s_neg - 1)^2 = 2*s_pos^2
    s_pos = 1.0 / (1.0 + jnp.exp(d_neg - d_pos))  # (tile_n, 1), exact divide

    # Mask rows beyond the true batch size (ragged last tile reads undefined
    # data; zero its contribution).
    row = i * tile_n + jax.lax.broadcasted_iota(jnp.int32, (tile_n, 1), 0)
    sq_ref[...] = jnp.where(row < n_rows, s_pos * s_pos, 0.0)


def triplet_loss(f_v, f_pos, f_neg):
    n, d = f_v.shape
    tile_n = _choose_tile_n(n, d)
    num_tiles = pl.cdiv(n, tile_n)

    # TODO(synk): for very large D, add a trailing reduction grid axis over D
    # with per-row sum-of-squares scratch instead of full-D blocks.
    in_spec = pl.BlockSpec((tile_n, d), lambda i: (i, 0))
    out_spec = pl.BlockSpec((tile_n, 1), lambda i: (i, 0))

    kernel = functools.partial(_triplet_kernel, n_rows=n, tile_n=tile_n)

    per_row_sq = pl.pallas_call(
        kernel,
        out_shape=jax.ShapeDtypeStruct((num_tiles * tile_n, 1), jnp.float32),
        grid=(num_tiles,),
        in_specs=[in_spec, in_spec, in_spec],
        out_specs=out_spec,
        compiler_params=pltpu.CompilerParams(
            dimension_semantics=("parallel",),
            vmem_limit_bytes=32 * 1024 * 1024,
        ),
    )(f_v, f_pos, f_neg)

    # loss = mean over the (N, 2) softmax-error matrix = sum(2*s_pos^2) / (2N)
    return jnp.sum(per_row_sq) / jnp.float32(n)


def _ref_triplet_loss(f_v, f_pos, f_neg):
    # pure-JAX reference mirroring the PyTorch forward
    d_pos = jnp.linalg.norm(f_v - f_pos + _EPS, axis=-1)
    d_neg = jnp.linalg.norm(f_v - f_neg + _EPS, axis=-1)
    dist = jnp.stack((d_pos, d_neg), axis=1)
    sm = jax.nn.softmax(dist, axis=-1)
    target = jnp.stack((jnp.zeros(f_v.shape[0]), jnp.ones(f_v.shape[0])), axis=1)
    return jnp.mean((sm - target) ** 2)


if __name__ == "__main__":
    key = jax.random.PRNGKey(0)
    k1, k2, k3 = jax.random.split(key, 3)
    N, D = 8, 32
    f_v = jax.random.normal(k1, (N, D), dtype=jnp.float32)
    f_pos = f_v + 0.1 * jax.random.normal(k2, (N, D), dtype=jnp.float32)
    f_neg = jax.random.normal(k3, (N, D), dtype=jnp.float32)

    loss = triplet_loss(f_v, f_pos, f_neg)
    jax.block_until_ready(loss)

    ref = _ref_triplet_loss(f_v, f_pos, f_neg)
    assert jnp.allclose(loss, ref, atol=1e-5, rtol=1e-5), (loss, ref)
    print("KERNEL_OK")
</pallas_src>

<mosaic_0001>
module attributes {stable_mosaic.version = 11 : i64} {
  func.func @_triplet_kernel(%arg0: i32, %arg1: memref<8x32xf32, #tpu.memory_space<vmem>>, %arg2: memref<8x32xf32, #tpu.memory_space<vmem>>, %arg3: memref<8x32xf32, #tpu.memory_space<vmem>>, %arg4: memref<8x1xf32, #tpu.memory_space<vmem>>) attributes {dimension_semantics = [#tpu.dimension_semantics<parallel>], iteration_bounds = array<i64: 1>, scalar_prefetch = 0 : i64, scratch_operands = 0 : i64, tpu.core_type = #tpu.core_type<tc>, window_params = [{transform_indices = @transform_0, window_bounds = array<i64: 8, 32>}, {transform_indices = @transform_1, window_bounds = array<i64: 8, 32>}, {transform_indices = @transform_2, window_bounds = array<i64: 8, 32>}, {transform_indices = @transform_3, window_bounds = array<i64: 8, 1>}]} {
    %c0 = arith.constant 0 : index
    %c0_0 = arith.constant 0 : index
    %0 = vector.load %arg1[%c0, %c0_0] : memref<8x32xf32, #tpu.memory_space<vmem>>, vector<8x32xf32>
    %c0_1 = arith.constant 0 : index
    %c0_2 = arith.constant 0 : index
    %1 = vector.load %arg2[%c0_1, %c0_2] : memref<8x32xf32, #tpu.memory_space<vmem>>, vector<8x32xf32>
    %c0_3 = arith.constant 0 : index
    %c0_4 = arith.constant 0 : index
    %2 = vector.load %arg3[%c0_3, %c0_4] : memref<8x32xf32, #tpu.memory_space<vmem>>, vector<8x32xf32>
    %3 = arith.subf %0, %1 : vector<8x32xf32>
    %cst = arith.constant 9.99999997E-7 : f32
    %4 = vector.broadcast %cst : f32 to vector<8x32xf32>
    %5 = arith.addf %3, %4 : vector<8x32xf32>
    %6 = arith.subf %0, %2 : vector<8x32xf32>
    %cst_5 = arith.constant 9.99999997E-7 : f32
    %7 = vector.broadcast %cst_5 : f32 to vector<8x32xf32>
    %8 = arith.addf %6, %7 : vector<8x32xf32>
    %9 = arith.mulf %5, %5 : vector<8x32xf32>
    %cst_6 = arith.constant dense<0.000000e+00> : vector<8xf32>
    %10 = vector.multi_reduction <add>, %9, %cst_6 [1] : vector<8x32xf32> to vector<8xf32>
    %11 = vector.shape_cast %10 : vector<8xf32> to vector<8x1xf32>
    %12 = math.sqrt %11 : vector<8x1xf32>
    %13 = arith.mulf %8, %8 : vector<8x32xf32>
    %cst_7 = arith.constant dense<0.000000e+00> : vector<8xf32>
    %14 = vector.multi_reduction <add>, %13, %cst_7 [1] : vector<8x32xf32> to vector<8xf32>
    %15 = vector.shape_cast %14 : vector<8xf32> to vector<8x1xf32>
    %16 = math.sqrt %15 : vector<8x1xf32>
    %17 = arith.subf %16, %12 : vector<8x1xf32>
    %18 = math.exp %17 : vector<8x1xf32>
    %cst_8 = arith.constant 1.000000e+00 : f32
    %19 = vector.broadcast %cst_8 : f32 to vector<8x1xf32>
    %20 = arith.addf %19, %18 : vector<8x1xf32>
    %cst_9 = arith.constant 1.000000e+00 : f32
    %21 = vector.broadcast %cst_9 : f32 to vector<8x1xf32>
    %22 = arith.divf %21, %20 : vector<8x1xf32>
    %c8_i32 = arith.constant 8 : i32
    %23 = arith.muli %arg0, %c8_i32 : i32
    %24 = tpu.iota {dimensions = array<i32: 0>} : vector<8x1xi32>
    %25 = vector.broadcast %23 : i32 to vector<8x1xi32>
    %26 = arith.addi %25, %24 : vector<8x1xi32>
    %c8_i32_10 = arith.constant 8 : i32
    %27 = vector.broadcast %c8_i32_10 : i32 to vector<8x1xi32>
    %28 = arith.cmpi slt, %26, %27 : vector<8x1xi32>
    %29 = arith.mulf %22, %22 : vector<8x1xf32>
    %cst_11 = arith.constant 0.000000e+00 : f32
    %30 = vector.broadcast %cst_11 : f32 to vector<8x1xf32>
    %31 = arith.select %28, %29, %30 : vector<8x1xi1>, vector<8x1xf32>
    %c0_12 = arith.constant 0 : index
    %c0_13 = arith.constant 0 : index
    %32 = vector.load %arg4[%c0_12, %c0_13] : memref<8x1xf32, #tpu.memory_space<vmem>>, vector<8x1xf32>
    tpu.vector_store %arg4[%c0_12, %c0_13], %31 {strides = array<i32>} : memref<8x1xf32, #tpu.memory_space<vmem>>, vector<8x1xf32>,
    return
  }
  func.func @transform_0(%arg0: i32) -> (i32, i32) {
    %c0_i32 = arith.constant 0 : i32
    %c0_i32_0 = arith.constant 0 : i32
    return %arg0, %c0_i32 : i32, i32
  }
  func.func @transform_1(%arg0: i32) -> (i32, i32) {
    %c0_i32 = arith.constant 0 : i32
    %c0_i32_0 = arith.constant 0 : i32
    return %arg0, %c0_i32 : i32, i32
  }
  func.func @transform_2(%arg0: i32) -> (i32, i32) {
    %c0_i32 = arith.constant 0 : i32
    %c0_i32_0 = arith.constant 0 : i32
    return %arg0, %c0_i32 : i32, i32
  }
  func.func @transform_3(%arg0: i32) -> (i32, i32) {
    %c0_i32 = arith.constant 0 : i32
    %c0_i32_0 = arith.constant 0 : i32
    return %arg0, %c0_i32 : i32, i32
  }
}

</mosaic_0001>

<bundles_post_ra>
// kernel: tpu_custom_call.1
= control target key start
LH: loop header
LB: loop body
LE: loop exit
PB: predicated region body
PF: predicated region fallthrough
CT: control target
= control target key end

     0   :  { %8 = vsyncpa [#allocation3], 0  ;;  %s252_s0 = inlined_call_operand.hbm [shape: f32[8,32], index: 0, kind: input, shape index: {}]   ;;  %s253_s1 = inlined_call_operand.hbm [shape: f32[8,32], index: 1, kind: input, shape index: {}]   ;;  %s254_s2 = inlined_call_operand.hbm [shape: f32[8,32], index: 2, kind: input, shape index: {}]   ;;  %s255_s3 = inlined_call_operand.vmem [shape: f32[8,1], index: 3, kind: output, shape index: {}]  }
   0x1   :  { %9 = vsyncpa [#allocation5], 0  ;;  %s26_s14 = sshll.u32 %s253_s1, 4  ;;  %s217_s15 = smov [#allocation4]   ;;  %s27_s14 = int_to_ptr.hbm [resolvable:$true] %s26_s14 }
   0x2   :  { %s28_s16 = sshll.u32 %s217_s15, 4  ;;  %s15_s19 = sshll.u32 %s252_s0, 4  ;;  %s29_s16 = int_to_ptr.vmem [resolvable:$true] %s28_s16  ;;  %s16_s19 = int_to_ptr.hbm [resolvable:$true] %s15_s19 }
   0x3   :  { %31 = dma.hbm_to_vmem [thread:$0]  %s27_s14, 128, %s29_s16, [#allocation5]  }
   0x4   :  { %s218_s20 = smov [#allocation2]   ;;  %s37_s24 = sshll.u32 %s254_s2, 4  ;;  %s38_s24 = int_to_ptr.hbm [resolvable:$true] %s37_s24 }
   0x5   :  { %s17_s21 = sshll.u32 %s218_s20, 4  ;;  %s219_s1 = smov [#allocation6]   ;;  %s18_s21 = int_to_ptr.vmem [resolvable:$true] %s17_s21 }
   0x6   :  { %20 = dma.hbm_to_vmem [thread:$0]  %s16_s19, 128, %s18_s21, [#allocation3]  }
   0x7   :  { %s39_s25 = sshll.u32 %s219_s1, 4  ;;  %s40_s25 = int_to_ptr.vmem [resolvable:$true] %s39_s25 }
   0x8   :  { %42 = dma.hbm_to_vmem [thread:$0]  %s38_s24, 128, %s40_s25, [#allocation5]  }
   0x9   :  { %213 = dma.done.wait [#allocation3], 128  }
   0xa   :  { %214 = vsyncadd [#allocation3], 4294967168 }
   0xb   :  { %215 = dma.done.wait [#allocation5], 256  }
   0xc   :  { %216 = vsyncadd [#allocation5], 4294967040  ;;  %v55_v0 = vld [vmem:[#allocation2] sm:$0xff]  ;;  %v56_v1 = vld [vmem:[#allocation4] sm:$0xff]  ;;  %vm63_vm0 = vcmask 261120   ;;  %vm122_vm9 = vcmask 7168  }
   0xd   :  { %v57_v2 = vld [vmem:[#allocation6] sm:$0xff]  ;;  %v58_v3 = vsub.f32 %v55_v0, %v56_v1 }
   0xe   :  { %v60_v4 = vsub.f32 %v55_v0, %v57_v2 }
   0xf   :  { %v59_v5 = vadd.f32 1e-06, %v58_v3 }
  0x10   :  { %v61_v7 = vadd.f32 1e-06, %v60_v4 }
  0x11   :  { %v62_v6 = vmul.f32 %v59_v5, %v59_v5 }
  0x12   :  { %v79_v9 = vmul.f32 %v61_v7, %v61_v7 }
  0x13   :  { %v64_v8 = vsel %vm63_vm0, %v62_v6, 0.0 }
  0x14   :  { %65 = vadd.xlane.f32.xlu0 %v64_v8  ;;  %v80_v10 = vsel %vm63_vm0, %v79_v9, 0.0 }
  0x1c   :  { %81 = vadd.xlane.f32.xlu0 %v80_v10 }
  0x87   :  { %v66_v11 = vpop.xlane.xlu0 %65 }
  0x88   :  { %133 = vrsqrt.f32 %v66_v11  ;;  %vm74_vm1 = vcmp.eq.f32.partialorder %v66_v11, inf  ;;  %v77_v28 = vand.u32 2147483648, %v66_v11  ;;  %vm76_vm3 = vcmp.eq.f32.partialorder %v66_v11, 0.0 }
  0x8e   :  { %v134_v12 = vpop.eup %133 }
  0x8f   :  { %v68_v13 = vmul.f32 %v134_v12, %v66_v11  ;;  %v82_v14 = vpop.xlane.xlu0 %81 }
  0x90   :  { %135 = vrsqrt.f32 %v82_v14  ;;  %vm90_vm2 = vcmp.eq.f32.partialorder %v82_v14, inf  ;;  %v93_v29 = vand.u32 2147483648, %v82_v14  ;;  %vm92_vm4 = vcmp.eq.f32.partialorder %v82_v14, 0.0 }
  0x91   :  { %v69_v15 = vmul.f32 %v134_v12, %v68_v13 }
  0x93   :  { %v70_v16 = vmul.f32 0.5, %v69_v15 }
  0x95   :  { %v71_v17 = vsub.f32 1.5, %v70_v16 }
  0x96   :  { %v136_v18 = vpop.eup %135 }
  0x97   :  { %v84_v19 = vmul.f32 %v136_v18, %v82_v14  ;;  %v72_v20 = vmul.f32 %v134_v12, %v71_v17 }
  0x99   :  { %v85_v21 = vmul.f32 %v136_v18, %v84_v19  ;;  %v73_v23 = vmul.f32 %v72_v20, %v66_v11 }
  0x9b   :  { %v86_v22 = vmul.f32 0.5, %v85_v21  ;;  %v75_v26 = vsel %vm74_vm1, %v66_v11, %v73_v23 }
  0x9c   :  { %v78_v31 = vsel %vm76_vm3, %v77_v28, %v75_v26 }
  0x9d   :  { %v87_v24 = vsub.f32 1.5, %v86_v22 }
  0x9f   :  { %v88_v25 = vmul.f32 %v136_v18, %v87_v24 }
  0xa1   :  { %v89_v27 = vmul.f32 %v88_v25, %v82_v14 }
  0xa3   :  { %v91_v30 = vsel %vm90_vm2, %v82_v14, %v89_v27 }
  0xa4   :  { %v94_v32 = vsel %vm92_vm4, %v93_v29, %v91_v30 }
  0xa5   :  { %v95_v33 = vsub.f32 %v94_v32, %v78_v31 }
  0xa7   :  { %v96_v34 = vmul.f32 1.442695, %v95_v33 }
  0xa9   :  { %137 = vpow2.f32 %v96_v34 }
  0xaf   :  { %v138_v35 = vpop.eup %137 }
  0xb0   :  { %v98_v36 = vadd.f32 1.0, %v138_v35 }
  0xb2   :  { %139 = vrcp.f32 %v98_v36  ;;  %v110_v40 = vand.u32 2147483648, %v98_v36  ;;  %v108_v42 = vand.u32 2147483647, %v98_v36  ;;  %vm104_vm6 = vweird.f32 %v98_v36 }
  0xb4   :  { %v111_v44 = vor.u32 1.1754944e-38, %v110_v40  ;;  %vm109_vm8 = vcmp.eq.f32.partialorder %v108_v42, 8.507059e+37 }
  0xb8   :  { %v140_v37 = vpop.eup %139 }
  0xb9   :  { %v100_v38 = vmul.f32 %v140_v37, %v98_v36  ;;  %vm105_vm5 = vweird.f32 %v140_v37 }
  0xba   :  { %vm106_vm7 = vmor %vm104_vm6, %vm105_vm5 }
  0xbb   :  { %v101_v39 = vsub.f32 1.0, %v100_v38 }
  0xbd   :  { %v102_v41 = vmul.f32 %v140_v37, %v101_v39 }
  0xbf   :  { %v103_v43 = vadd.f32 %v140_v37, %v102_v41 }
  0xc1   :  { %v107_v45 = vsel %vm106_vm7, %v140_v37, %v103_v43 }
  0xc2   :  { %v112_v46 = vsel %vm109_vm8, %v111_v44, %v107_v45 }
  0xc3   :  { %v120_v47 = vmul.f32 %v112_v46, %v112_v46 }
  0xc5   :  { %123 = vst.msk [vmem:[%s255_s3] sm:$0xff] %vm122_vm9, %v120_v47 }
  0xc6   :  { %128 = vsyncpa [#allocation3], 1 }
  0xc7   :  { %129 = vsyncpa [#allocation5], 1 }

</bundles_post_ra>
